<compile_context>
chip_gen: v7x
topology: tpu7x:2x2x1
jax: 0.10.0
libtpu: 0.0.40
codegen_flags: <defaults>
</compile_context>

<pallas_src>
import functools

import jax
import jax.numpy as jnp
from jax.experimental import pallas as pl
from jax.experimental.pallas import tpu as pltpu


def _round_up(x, m):
    return ((x + m - 1) // m) * m


# ---------------- fused patch-projection (matmul + bias) + LayerNorm kernel ----------------
def _proj_ln_kernel(p_ref, w_ref, b_ref, g_ref, beta_ref, o_ref, *, eps):
    # p_ref: (tm, Kc) im2col rows ; w_ref: (Kc, C) ; b/g/beta: (1, C) ; o_ref: (tm, C)
    p = p_ref[...].astype(jnp.float32)
    # Single MXU contraction over K*K*Cin, fp32 accumulation.
    y = jnp.dot(p, w_ref[...], preferred_element_type=jnp.float32) + b_ref[...]
    # LayerNorm over the lane-dense embed_dim axis, fused so tokens hit HBM once.
    mean = jnp.mean(y, axis=-1, keepdims=True)
    cent = y - mean
    var = jnp.mean(cent * cent, axis=-1, keepdims=True)
    yn = cent * jax.lax.rsqrt(var + eps)          # rsqrt -> EUP slot (free under MXU work)
    o_ref[...] = (yn * g_ref[...] + beta_ref[...]).astype(o_ref.dtype)


# ------------------------------- public forward wrapper -------------------------------
def overlap_patch_embed(x_nchw, params, *, patch_size=7, stride=4, tm=512, eps=1e-5):
    """Matches OverlapPatchEmbed.forward: returns (tokens (B, Ho*Wo, C), Ho, Wo)."""
    B, Cin, H, W = x_nchw.shape
    K = patch_size
    pad = patch_size // (2 * 2)                 # == patch_size // 4, as in the module
    w = params["proj_w"]                        # (C, Cin, K, K)  (PyTorch OIHW layout)
    b = params["proj_b"]                        # (C,)
    C = w.shape[0]

    Ho = (H + 2 * pad - K) // stride + 1
    Wo = (W + 2 * pad - K) // stride + 1
    M = B * Ho * Wo
    Kc = Cin * K * K

    # ---- im2col on the (tiny, Cin=3) input: strided XLA slices, no Pallas needed ----
    # TODO(synk): overlapping-window gather (stride < kernel) has no clean BlockSpec
    # expression; kept as XLA strided slices in the wrapper.
    xp = jnp.pad(x_nchw, ((0, 0), (0, 0), (pad, pad), (pad, pad)))
    cols = jnp.stack(
        [xp[:, :,
            kh:kh + stride * (Ho - 1) + 1:stride,
            kw:kw + stride * (Wo - 1) + 1:stride]
         for kh in range(K) for kw in range(K)],
        axis=2)                                  # (B, Cin, K*K, Ho, Wo)
    # flatten to (tokens, Cin*K*K) with (cin slow, kh, kw fast) -> matches OIHW flatten
    patches = cols.transpose(0, 3, 4, 1, 2).reshape(M, Kc)

    # Row tile: as big as reasonable (amortizes per-grid-step overhead), clamped for
    # tiny inputs so padded rows stay a small fraction of the work.
    tm = max(8, min(tm, _round_up(M, 8)))
    Mp = _round_up(M, tm)
    if Mp != M:
        patches = jnp.pad(patches, ((0, Mp - M), (0, 0)))

    w_mat = w.reshape(C, Kc).T                   # (Kc, C) -> lane-dense output columns

    kernel = functools.partial(_proj_ln_kernel, eps=eps)
    cost = pl.CostEstimate(
        flops=2 * Mp * Kc * C + 6 * Mp * C,
        transcendentals=Mp,
        bytes_accessed=(Mp * Kc + Kc * C + Mp * C + 3 * C) * 4,
    )
    out = pl.pallas_call(
        kernel,
        out_shape=jax.ShapeDtypeStruct((Mp, C), x_nchw.dtype),
        grid_spec=pltpu.PrefetchScalarGridSpec(
            num_scalar_prefetch=0,
            grid=(Mp // tm,),
            in_specs=[
                pl.BlockSpec((tm, Kc), lambda i: (i, 0)),     # im2col rows (streamed)
                pl.BlockSpec((Kc, C), lambda i: (0, 0)),      # projection weight (resident)
                pl.BlockSpec((1, C), lambda i: (0, 0)),       # conv bias
                pl.BlockSpec((1, C), lambda i: (0, 0)),       # LN gamma
                pl.BlockSpec((1, C), lambda i: (0, 0)),       # LN beta
            ],
            out_specs=pl.BlockSpec((tm, C), lambda i: (i, 0)),  # lane-dense token tile
        ),
        compiler_params=pltpu.CompilerParams(
            dimension_semantics=("parallel",),                  # megacore-shardable
            vmem_limit_bytes=32 * 1024 * 1024,                  # fits v5e/v6e/v7x budgets
        ),
        cost_estimate=cost,
    )(patches, w_mat, b.reshape(1, C),
      params["ln_w"].reshape(1, C), params["ln_b"].reshape(1, C))

    tokens = out[:M].reshape(B, Ho * Wo, C)
    return tokens, Ho, Wo


# ------------------------------ deterministic params ------------------------------
def init_params(key, in_chans, embed_dim, patch_size):
    ks = jax.random.split(key, 4)
    fan_out = patch_size * patch_size * embed_dim
    std = (2.0 / fan_out) ** 0.5
    return {
        "proj_w": std * jax.random.normal(
            ks[0], (embed_dim, in_chans, patch_size, patch_size), jnp.float32),
        "proj_b": 0.02 * jax.random.normal(ks[1], (embed_dim,), jnp.float32),
        "ln_w": 1.0 + 0.05 * jax.random.normal(ks[2], (embed_dim,), jnp.float32),
        "ln_b": 0.05 * jax.random.normal(ks[3], (embed_dim,), jnp.float32),
    }


# ------------------------------ plain-JAX reference ------------------------------
def overlap_patch_embed_reference(x_nchw, params, *, patch_size=7, stride=4, eps=1e-5):
    pad = patch_size // (2 * 2)
    y = jax.lax.conv_general_dilated(
        x_nchw, params["proj_w"], window_strides=(stride, stride),
        padding=((pad, pad), (pad, pad)),
        dimension_numbers=("NCHW", "OIHW", "NCHW"))
    y = y + params["proj_b"][None, :, None, None]
    B, C, Ho, Wo = y.shape
    t = y.reshape(B, C, Ho * Wo).transpose(0, 2, 1)        # (B, N, C)
    mean = jnp.mean(t, axis=-1, keepdims=True)
    var = jnp.mean((t - mean) ** 2, axis=-1, keepdims=True)
    t = (t - mean) / jnp.sqrt(var + eps) * params["ln_w"] + params["ln_b"]
    return t, Ho, Wo


if __name__ == "__main__":
    key = jax.random.PRNGKey(0)
    kx, kp = jax.random.split(key)

    B, Cin, H, W = 2, 3, 32, 32
    embed_dim, patch_size, stride = 128, 7, 4

    x = jax.random.normal(kx, (B, Cin, H, W), jnp.float32)
    params = init_params(kp, Cin, embed_dim, patch_size)

    tok, Ho, Wo = overlap_patch_embed(x, params, patch_size=patch_size, stride=stride)
    tok = jax.block_until_ready(tok)

    ref, Hr, Wr = overlap_patch_embed_reference(x, params,
                                                patch_size=patch_size, stride=stride)
    ref = jax.block_until_ready(ref)

    assert (Ho, Wo) == (Hr, Wr), f"spatial mismatch {(Ho, Wo)} vs {(Hr, Wr)}"
    assert tok.shape == (B, Ho * Wo, embed_dim), f"bad shape {tok.shape}"
    max_err = float(jnp.max(jnp.abs(tok - ref)))
    assert jnp.allclose(tok, ref, atol=1e-4, rtol=1e-4), f"max err {max_err}"
    print("KERNEL_OK")
</pallas_src>

<mosaic_0001>
module attributes {stable_mosaic.version = 11 : i64} {
  func.func @_proj_ln_kernel(%arg0: i32, %arg1: memref<104x147xf32, #tpu.memory_space<vmem>>, %arg2: memref<147x128xf32, #tpu.memory_space<vmem>>, %arg3: memref<1x128xf32, #tpu.memory_space<vmem>>, %arg4: memref<1x128xf32, #tpu.memory_space<vmem>>, %arg5: memref<1x128xf32, #tpu.memory_space<vmem>>, %arg6: memref<104x128xf32, #tpu.memory_space<vmem>>) attributes {dimension_semantics = [#tpu.dimension_semantics<parallel>], iteration_bounds = array<i64: 1>, scalar_prefetch = 0 : i64, scratch_operands = 0 : i64, tpu.core_type = #tpu.core_type<tc>, window_params = [{transform_indices = @transform_0, window_bounds = array<i64: 104, 147>}, {pipeline_mode = #tpu.pipeline_mode<synchronous>, transform_indices = @transform_1, window_bounds = array<i64: 147, 128>}, {pipeline_mode = #tpu.pipeline_mode<synchronous>, transform_indices = @transform_2, window_bounds = array<i64: 1, 128>}, {pipeline_mode = #tpu.pipeline_mode<synchronous>, transform_indices = @transform_3, window_bounds = array<i64: 1, 128>}, {pipeline_mode = #tpu.pipeline_mode<synchronous>, transform_indices = @transform_4, window_bounds = array<i64: 1, 128>}, {transform_indices = @transform_5, window_bounds = array<i64: 104, 128>}]} {
    %c0 = arith.constant 0 : index
    %c0_0 = arith.constant 0 : index
    %0 = vector.load %arg1[%c0, %c0_0] : memref<104x147xf32, #tpu.memory_space<vmem>>, vector<104x147xf32>
    %c0_1 = arith.constant 0 : index
    %c0_2 = arith.constant 0 : index
    %1 = vector.load %arg2[%c0_1, %c0_2] : memref<147x128xf32, #tpu.memory_space<vmem>>, vector<147x128xf32>
    %cst = arith.constant dense<0.000000e+00> : vector<104x128xf32>
    %2 = tpu.matmul %0, %1, %cst {dimension_numbers = #tpu.dot_dimension_numbers<[1], [0], [0], [1], [0, 0, 1, 1], [], []>} : vector<104x147xf32>, vector<147x128xf32>, vector<104x128xf32> -> vector<104x128xf32>
    %c0_3 = arith.constant 0 : index
    %c0_4 = arith.constant 0 : index
    %3 = vector.load %arg3[%c0_3, %c0_4] : memref<1x128xf32, #tpu.memory_space<vmem>>, vector<1x128xf32>
    %4 = vector.broadcast %3 : vector<1x128xf32> to vector<104x128xf32>
    %5 = arith.addf %2, %4 : vector<104x128xf32>
    %cst_5 = arith.constant dense<0.000000e+00> : vector<104xf32>
    %6 = vector.multi_reduction <add>, %5, %cst_5 [1] : vector<104x128xf32> to vector<104xf32>
    %7 = vector.shape_cast %6 : vector<104xf32> to vector<104x1xf32>
    %cst_6 = arith.constant 1.280000e+02 : f32
    %8 = vector.broadcast %cst_6 : f32 to vector<104x1xf32>
    %9 = arith.divf %7, %8 : vector<104x1xf32>
    %10 = vector.broadcast %9 : vector<104x1xf32> to vector<104x128xf32>
    %11 = arith.subf %5, %10 : vector<104x128xf32>
    %12 = arith.mulf %11, %11 : vector<104x128xf32>
    %cst_7 = arith.constant dense<0.000000e+00> : vector<104xf32>
    %13 = vector.multi_reduction <add>, %12, %cst_7 [1] : vector<104x128xf32> to vector<104xf32>
    %14 = vector.shape_cast %13 : vector<104xf32> to vector<104x1xf32>
    %cst_8 = arith.constant 1.280000e+02 : f32
    %15 = vector.broadcast %cst_8 : f32 to vector<104x1xf32>
    %16 = arith.divf %14, %15 : vector<104x1xf32>
    %cst_9 = arith.constant 9.99999974E-6 : f32
    %17 = vector.broadcast %cst_9 : f32 to vector<104x1xf32>
    %18 = arith.addf %16, %17 : vector<104x1xf32>
    %19 = math.rsqrt %18 : vector<104x1xf32>
    %20 = vector.broadcast %19 : vector<104x1xf32> to vector<104x128xf32>
    %21 = arith.mulf %11, %20 : vector<104x128xf32>
    %c0_10 = arith.constant 0 : index
    %c0_11 = arith.constant 0 : index
    %22 = vector.load %arg4[%c0_10, %c0_11] : memref<1x128xf32, #tpu.memory_space<vmem>>, vector<1x128xf32>
    %23 = vector.broadcast %22 : vector<1x128xf32> to vector<104x128xf32>
    %24 = arith.mulf %21, %23 : vector<104x128xf32>
    %c0_12 = arith.constant 0 : index
    %c0_13 = arith.constant 0 : index
    %25 = vector.load %arg5[%c0_12, %c0_13] : memref<1x128xf32, #tpu.memory_space<vmem>>, vector<1x128xf32>
    %26 = vector.broadcast %25 : vector<1x128xf32> to vector<104x128xf32>
    %27 = arith.addf %24, %26 : vector<104x128xf32>
    %c0_14 = arith.constant 0 : index
    %c0_15 = arith.constant 0 : index
    %28 = vector.load %arg6[%c0_14, %c0_15] : memref<104x128xf32, #tpu.memory_space<vmem>>, vector<104x128xf32>
    tpu.vector_store %arg6[%c0_14, %c0_15], %27 {strides = array<i32>} : memref<104x128xf32, #tpu.memory_space<vmem>>, vector<104x128xf32>,
    return
  }
  func.func @transform_0(%arg0: i32) -> (i32, i32) {
    %c0_i32 = arith.constant 0 : i32
    %c0_i32_0 = arith.constant 0 : i32
    return %arg0, %c0_i32 : i32, i32
  }
  func.func @transform_1(%arg0: i32) -> (i32, i32) {
    %c0_i32 = arith.constant 0 : i32
    %c0_i32_0 = arith.constant 0 : i32
    %c0_i32_1 = arith.constant 0 : i32
    return %c0_i32, %c0_i32_0 : i32, i32
  }
  func.func @transform_2(%arg0: i32) -> (i32, i32) {
    %c0_i32 = arith.constant 0 : i32
    %c0_i32_0 = arith.constant 0 : i32
    %c0_i32_1 = arith.constant 0 : i32
    return %c0_i32, %c0_i32_0 : i32, i32
  }
  func.func @transform_3(%arg0: i32) -> (i32, i32) {
    %c0_i32 = arith.constant 0 : i32
    %c0_i32_0 = arith.constant 0 : i32
    %c0_i32_1 = arith.constant 0 : i32
    return %c0_i32, %c0_i32_0 : i32, i32
  }
  func.func @transform_4(%arg0: i32) -> (i32, i32) {
    %c0_i32 = arith.constant 0 : i32
    %c0_i32_0 = arith.constant 0 : i32
    %c0_i32_1 = arith.constant 0 : i32
    return %c0_i32, %c0_i32_0 : i32, i32
  }
  func.func @transform_5(%arg0: i32) -> (i32, i32) {
    %c0_i32 = arith.constant 0 : i32
    %c0_i32_0 = arith.constant 0 : i32
    return %arg0, %c0_i32 : i32, i32
  }
}

</mosaic_0001>

<bundles_post_ra>
// kernel: tpu_custom_call.1
= control target key start
LH: loop header
LB: loop body
LE: loop exit
PB: predicated region body
PF: predicated region fallthrough
CT: control target
= control target key end

     0   :  { %v579_v3 = vmov 0.0|0.0   ;;  %vm73_vm0 = vcmask 154624   ;;  %s900_s0 = inlined_call_operand.vmem [shape: f32[104,147], index: 0, kind: input, shape index: {}]   ;;  %s901_s1 = inlined_call_operand.vmem [shape: f32[147,128], index: 1, kind: input, shape index: {}]   ;;  %s902_s2 = inlined_call_operand.vmem [shape: f32[1,128], index: 2, kind: input, shape index: {}]   ;;  %s903_s3 = inlined_call_operand.vmem [shape: f32[1,128], index: 3, kind: input, shape index: {}]   ;;  %s904_s4 = inlined_call_operand.vmem [shape: f32[1,128], index: 4, kind: input, shape index: {}]   ;;  %s905_s5 = inlined_call_operand.hbm [shape: f32[104,128], index: 5, kind: output, shape index: {}]  }
   0x1   :  { %v47_v0 = vld [vmem:[%s901_s1] sm:$0xff]  ;;  %v48_v1 = vld [vmem:[%s901_s1 + $0x8] sm:$0xff]  ;;  %v49_v2 = vld [vmem:[%s901_s1 + $0x10] sm:$0xff]  ;;  %477 = vmatprep.subr.bf16.mxu0 %v579_v3  ;;  %504 = vmatprep.subr.bf16.mxu1 %v579_v3 }
   0x2   :  { %v478_v4 = vpack.c.bf16 %v48_v1, %v47_v0  ;;  %v50_v5 = vld [vmem:[%s901_s1 + $0x18] sm:$0xff]  ;;  %v51_v7 = vld [vmem:[%s901_s1 + $0x20] sm:$0xff]  ;;  %v52_v8 = vld [vmem:[%s901_s1 + $0x28] sm:$0xff] }
   0x3   :  { %v481_v6 = vpack.c.bf16 %v50_v5, %v49_v2  ;;  %v22_v9 = vld [vmem:[%s900_s0 + $0x8] sm:$0xff]  ;;  %v36_v10 = vld [vmem:[%s900_s0 + $0x78] sm:$0xff]  ;;  %v484_v11 = vpack.c.bf16 %v52_v8, %v51_v7  ;;  %v53_v12 = vld [vmem:[%s901_s1 + $0x30] sm:$0xff] }
   0x4   :  { %479 = vmatpush1.bf16.msra.mxu0 %v478_v4  ;;  %514 = vmatpush1.bf16.msra.mxu1 %v478_v4  ;;  %v54_v13 = vld [vmem:[%s901_s1 + $0x38] sm:$0xff]  ;;  %v55_v15 = vld [vmem:[%s901_s1 + $0x40] sm:$0xff]  ;;  %v56_v16 = vld [vmem:[%s901_s1 + $0x48] sm:$0xff] }
   0x5   :  { %480 = vmatprep.subr.bf16.mxu0 %v579_v3  ;;  %505 = vmatprep.subr.bf16.mxu1 %v579_v3  ;;  %v487_v14 = vpack.c.bf16 %v54_v13, %v53_v12  ;;  %v490_v17 = vpack.c.bf16 %v56_v16, %v55_v15 }
   0x6   :  { %462 = vmatprep.mubr.msk.f32.mxu0 %vm73_vm0, %v22_v9  ;;  %469 = vmatprep.mubr.msk.f32.mxu1 %vm73_vm0, %v36_v10 }
   0x8   :  { %482 = vmatpush1.bf16.msra.mxu0 %v481_v6  ;;  %515 = vmatpush1.bf16.msra.mxu1 %v481_v6 }
   0x9   :  { %483 = vmatprep.subr.bf16.mxu0 %v579_v3  ;;  %506 = vmatprep.subr.bf16.mxu1 %v579_v3 }
   0xc   :  { %485 = vmatpush1.bf16.msra.mxu0 %v484_v11  ;;  %516 = vmatpush1.bf16.msra.mxu1 %v484_v11 }
   0xd   :  { %486 = vmatprep.subr.bf16.mxu0 %v579_v3  ;;  %507 = vmatprep.subr.bf16.mxu1 %v579_v3 }
  0x10   :  { %488 = vmatpush1.bf16.msra.mxu0 %v487_v14  ;;  %517 = vmatpush1.bf16.msra.mxu1 %v487_v14 }
  0x11   :  { %10 = vsyncpa [#allocation3], 0  ;;  %489 = vmatprep.subr.bf16.mxu0 %v579_v3  ;;  %508 = vmatprep.subr.bf16.mxu1 %v579_v3  ;;  %v57_v18 = vld [vmem:[%s901_s1 + $0x50] sm:$0xff]  ;;  %v58_v19 = vld [vmem:[%s901_s1 + $0x58] sm:$0xff]  ;;  %v580_v30 = vmov 0.0   ;;  %vm113_vm1 = vcmask 1042432  }
  0x12   :  { %v493_v20 = vpack.c.bf16 %v58_v19, %v57_v18  ;;  %v59_v21 = vld [vmem:[%s901_s1 + $0x60] sm:$0xff]  ;;  %v60_v22 = vld [vmem:[%s901_s1 + $0x68] sm:$0xff]  ;;  %v61_v24 = vld [vmem:[%s901_s1 + $0x70] sm:$0xff] }
  0x13   :  { %v496_v23 = vpack.c.bf16 %v60_v22, %v59_v21  ;;  %v62_v25 = vld [vmem:[%s901_s1 + $0x78] sm:$0xff]  ;;  %v63_v27 = vld [vmem:[%s901_s1 + $0x80] sm:$0xff]  ;;  %v64_v28 = vld [vmem:[%s901_s1 + $0x88] sm:$0xff] }
  0x14   :  { %491 = vmatpush1.bf16.msra.mxu0 %v490_v17  ;;  %518 = vmatpush1.bf16.msra.mxu1 %v490_v17  ;;  %v499_v26 = vpack.c.bf16 %v62_v25, %v61_v24  ;;  %v502_v29 = vpack.c.bf16 %v64_v28, %v63_v27  ;;  %v65_v31 = vld [vmem:[%s901_s1 + $0x90] sm:$0x7]  ;;  %v21_v32 = vld [vmem:[%s900_s0] sm:$0xff]  ;;  %v24_v34 = vld [vmem:[%s900_s0 + $0x18] sm:$0xff] }
  0x15   :  { %492 = vmatprep.subr.bf16.mxu0 %v579_v3  ;;  %509 = vmatprep.subr.bf16.mxu1 %v579_v3  ;;  %v35_v33 = vld [vmem:[%s900_s0 + $0x70] sm:$0xff]  ;;  %v38_v35 = vld [vmem:[%s900_s0 + $0x88] sm:$0xff]  ;;  %v37_v37 = vld [vmem:[%s900_s0 + $0x80] sm:$0xff] }
  0x16   :  { %v23_v36 = vld [vmem:[%s900_s0 + $0x10] sm:$0xff]  ;;  %v26_v38 = vld [vmem:[%s900_s0 + $0x28] sm:$0xff]  ;;  %v40_v39 = vld [vmem:[%s900_s0 + $0x98] sm:$0xff] }
  0x17   :  { %v25_v40 = vld [vmem:[%s900_s0 + $0x20] sm:$0xff]  ;;  %v39_v41 = vld [vmem:[%s900_s0 + $0x90] sm:$0xff]  ;;  %v28_v42 = vld [vmem:[%s900_s0 + $0x38] sm:$0xff] }
  0x18   :  { %494 = vmatpush1.bf16.msra.mxu0 %v493_v20  ;;  %519 = vmatpush1.bf16.msra.mxu1 %v493_v20  ;;  %v42_v43 = vld [vmem:[%s900_s0 + $0xa8] sm:$0xff]  ;;  %v27_v44 = vld [vmem:[%s900_s0 + $0x30] sm:$0xff]  ;;  %v41_v45 = vld [vmem:[%s900_s0 + $0xa0] sm:$0xff] }
  0x19   :  { %495 = vmatprep.subr.bf16.mxu0 %v579_v3  ;;  %510 = vmatprep.subr.bf16.mxu1 %v579_v3  ;;  %v30_v46 = vld [vmem:[%s900_s0 + $0x48] sm:$0xff]  ;;  %v44_v47 = vld [vmem:[%s900_s0 + $0xb8] sm:$0xff]  ;;  %v29_v48 = vld [vmem:[%s900_s0 + $0x40] sm:$0xff] }
  0x1a   :  { %v43_v49 = vld [vmem:[%s900_s0 + $0xb0] sm:$0xff]  ;;  %v32_v50 = vld [vmem:[%s900_s0 + $0x58] sm:$0xff]  ;;  %v46_v51 = vld [vmem:[%s900_s0 + $0xc8] sm:$0xff] }
  0x1b   :  { %v31_v52 = vld [vmem:[%s900_s0 + $0x50] sm:$0xff]  ;;  %v45_v53 = vld [vmem:[%s900_s0 + $0xc0] sm:$0xff]  ;;  %v34_v54 = vld [vmem:[%s900_s0 + $0x68] sm:$0xff] }
  0x1c   :  { %497 = vmatpush1.bf16.msra.mxu0 %v496_v23  ;;  %520 = vmatpush1.bf16.msra.mxu1 %v496_v23  ;;  %v33_v55 = vld [vmem:[%s900_s0 + $0x60] sm:$0xff] }
  0x1d   :  { %498 = vmatprep.subr.bf16.mxu0 %v579_v3  ;;  %511 = vmatprep.subr.bf16.mxu1 %v579_v3  ;;  %v460_v56 = vld [vmem:[%s902_s2] ss:$0 sm:$0xff] }
  0x20   :  { %500 = vmatpush1.bf16.msra.mxu0 %v499_v26  ;;  %521 = vmatpush1.bf16.msra.mxu1 %v499_v26 }
  0x21   :  { %501 = vmatprep.subr.bf16.mxu0 %v579_v3  ;;  %512 = vmatprep.subr.bf16.mxu1 %v579_v3 }
  0x24   :  { %503 = vmatpush1.bf16.msra.mxu0 %v502_v29  ;;  %522 = vmatpush1.bf16.msra.mxu1 %v502_v29 }
  0x25   :  { %153 = vmatprep.subr.mxu0 %v580_v30  ;;  %513 = vmatprep.subr.mxu1 %v580_v30 }
  0x28   :  { %461 = vmatpush1.msk.msra.mxu0 %vm113_vm1, %v65_v31  ;;  %523 = vmatpush1.msk.msra.mxu1 %vm113_vm1, %v65_v31 }
  0x29   :  { %182 = vmatmul.mubr.f32.vlgmr.msra.gmra.mrb[0].mxu0 %v21_v32  ;;  %217 = vmatmul.mubr.f32.vlgmr.msra.gmra.mrb[0].mxu1 %v35_v33 }
  0x2a   :  { %463 = vmatprep.mubr.msk.f32.mxu0 %vm73_vm0, %v24_v34  ;;  %470 = vmatprep.mubr.msk.f32.mxu1 %vm73_vm0, %v38_v35 }
  0x2d   :  { %187 = vmatmul.mubr.f32.gmra.mrb[2].mxu0 %v23_v36  ;;  %222 = vmatmul.mubr.f32.gmra.mrb[2].mxu1 %v37_v37 }
  0x2e   :  { %464 = vmatprep.mubr.msk.f32.mxu0 %vm73_vm0, %v26_v38  ;;  %471 = vmatprep.mubr.msk.f32.mxu1 %vm73_vm0, %v40_v39 }
  0x31   :  { %192 = vmatmul.mubr.f32.gmra.mrb[4].mxu0 %v25_v40  ;;  %227 = vmatmul.mubr.f32.gmra.mrb[4].mxu1 %v39_v41 }
  0x32   :  { %465 = vmatprep.mubr.msk.f32.mxu0 %vm73_vm0, %v28_v42  ;;  %472 = vmatprep.mubr.msk.f32.mxu1 %vm73_vm0, %v42_v43 }
  0x35   :  { %197 = vmatmul.mubr.f32.gmra.mrb[6].mxu0 %v27_v44  ;;  %232 = vmatmul.mubr.f32.gmra.mrb[6].mxu1 %v41_v45 }
  0x36   :  { %466 = vmatprep.mubr.msk.f32.mxu0 %vm73_vm0, %v30_v46  ;;  %473 = vmatprep.mubr.msk.f32.mxu1 %vm73_vm0, %v44_v47 }
  0x39   :  { %202 = vmatmul.mubr.f32.gmra.mrb[8].mxu0 %v29_v48  ;;  %237 = vmatmul.mubr.f32.gmra.mrb[8].mxu1 %v43_v49 }
  0x3a   :  { %467 = vmatprep.mubr.msk.f32.mxu0 %vm73_vm0, %v32_v50  ;;  %474 = vmatprep.mubr.msk.f32.mxu1 %vm73_vm0, %v46_v51 }
  0x3d   :  { %207 = vmatmul.mubr.f32.gmra.mrb[10].mxu0 %v31_v52  ;;  %242 = vmatmul.mubr.f32.gmra.mrb[10].mxu1 %v45_v53 }
  0x3e   :  { %468 = vmatprep.mubr.msk.f32.mxu0 %vm73_vm0, %v34_v54 }
  0x41   :  { %212 = vmatmul.mubr.f32.gmra.mrb[12].mxu0 %v33_v55 }
  0xfc   :  { %v183_v57 = vpop.f32.mrb[0].mxu0  ;;  %v218_v58 = vpop.f32.mrb[0].mxu1 }
  0xfd   :  { %v184_v59 = vadd.f32 %v460_v56, %v183_v57  ;;  %v219_v60 = vadd.f32 %v460_v56, %v218_v58  ;;  %v185_v61 = vpop.f32.mrb[1].mxu0  ;;  %v220_v62 = vpop.f32.mrb[1].mxu1 }
  0xff   :  { %261 = vadd.xlane.f32.xlu1 %v219_v60  ;;  %247 = vadd.xlane.f32.xlu0 %v184_v59 }
 0x100   :  { %v188_v63 = vpop.f32.mrb[2].mxu0  ;;  %v223_v0 = vpop.f32.mrb[2].mxu1 }
 0x101   :  { %v189_v1 = vadd.f32 %v460_v56, %v188_v63  ;;  %v190_v2 = vpop.f32.mrb[3].mxu0  ;;  %v225_v3 = vpop.f32.mrb[3].mxu1  ;;  %v224_v4 = vadd.f32 %v460_v56, %v223_v0 }
 0x103   :  { %249 = vadd.xlane.f32.xlu0 %v189_v1 }
 0x104   :  { %v193_v5 = vpop.f32.mrb[4].mxu0  ;;  %v228_v6 = vpop.f32.mrb[4].mxu1 }
 0x105   :  { %v194_v7 = vadd.f32 %v460_v56, %v193_v5  ;;  %v195_v8 = vpop.f32.mrb[5].mxu0  ;;  %v230_v9 = vpop.f32.mrb[5].mxu1  ;;  %v229_v10 = vadd.f32 %v460_v56, %v228_v6 }
 0x107   :  { %251 = vadd.xlane.f32.xlu1 %v194_v7  ;;  %263 = vadd.xlane.f32.xlu0 %v224_v4 }
 0x108   :  { %v198_v11 = vpop.f32.mrb[6].mxu0  ;;  %v233_v12 = vpop.f32.mrb[6].mxu1 }
 0x109   :  { %v234_v13 = vadd.f32 %v460_v56, %v233_v12  ;;  %v200_v14 = vpop.f32.mrb[7].mxu0  ;;  %v235_v15 = vpop.f32.mrb[7].mxu1  ;;  %v199_v18 = vadd.f32 %v460_v56, %v198_v11 }
 0x10b   :  { %265 = vadd.xlane.f32.xlu1 %v229_v10  ;;  %267 = vadd.xlane.f32.xlu0 %v234_v13 }
 0x10c   :  { %v203_v16 = vpop.f32.mrb[8].mxu0  ;;  %v238_v17 = vpop.f32.mrb[8].mxu1 }
 0x10d   :  { %v204_v19 = vadd.f32 %v460_v56, %v203_v16  ;;  %v205_v20 = vpop.f32.mrb[9].mxu0  ;;  %v240_v21 = vpop.f32.mrb[9].mxu1  ;;  %v239_v27 = vadd.f32 %v460_v56, %v238_v17 }
 0x10f   :  { %253 = vadd.xlane.f32.xlu1 %v199_v18  ;;  %255 = vadd.xlane.f32.xlu0 %v204_v19 }
 0x110   :  { %v208_v22 = vpop.f32.mrb[10].mxu0  ;;  %v243_v23 = vpop.f32.mrb[10].mxu1 }
 0x111   :  { %v209_v24 = vadd.f32 %v460_v56, %v208_v22  ;;  %v210_v25 = vpop.f32.mrb[11].mxu0  ;;  %v245_v26 = vpop.f32.mrb[11].mxu1  ;;  %v783_v31 = vadd.f32 %v460_v56, %v243_v23 }
 0x113   :  { %257 = vadd.xlane.f32.xlu1 %v209_v24 }
 0x114   :  { %v213_v28 = vpop.f32.mrb[12].mxu0 }
 0x115   :  { %v214_v29 = vadd.f32 %v460_v56, %v213_v28  ;;  %v215_v30 = vpop.f32.mrb[13].mxu0 }
 0x117   :  { %269 = vadd.xlane.f32.xlu1 %v239_v27  ;;  %259 = vadd.xlane.f32.xlu0 %v214_v29 }
 0x11b   :  { %271 = vadd.xlane.f32.xlu0 %v783_v31 }
 0x18c   :  { %v262_v32 = vpop.xlane.xlu1 %261  ;;  %v248_v33 = vpop.xlane.xlu0 %247 }
 0x18d   :  { %v281_v34 = vmul.f32 0.0078125, %v262_v32  ;;  %v274_v35 = vmul.f32 0.0078125, %v248_v33 }
 0x18f   :  { %v786_v36 = vsub.f32 %v219_v60, %v281_v34  ;;  %v788_v37 = vsub.f32 %v184_v59, %v274_v35 }
 0x190   :  { %v250_v38 = vpop.xlane.xlu0 %249 }
 0x191   :  { %v275_v39 = vmul.f32 0.0078125, %v250_v38  ;;  %v307_v40 = vmul.f32 %v786_v36, %v786_v36  ;;  %v300_v41 = vmul.f32 %v788_v37, %v788_v37 }
 0x193   :  { %v794_v42 = vsub.f32 %v189_v1, %v275_v39  ;;  %327 = vadd.xlane.f32.xlu0 %v307_v40  ;;  %313 = vadd.xlane.f32.xlu1 %v300_v41  ;;  %v842_v39 = vld [vmem:[%s903_s3] ss:$0 sm:$0xff]  ;;  %s581_s3 = smov [#allocation2]  }
 0x194   :  { %v252_v43 = vpop.xlane.xlu1 %251  ;;  %v264_v44 = vpop.xlane.xlu0 %263 }
 0x195   :  { %v276_v45 = vmul.f32 0.0078125, %v252_v43  ;;  %v282_v46 = vmul.f32 0.0078125, %v264_v44  ;;  %v301_v47 = vmul.f32 %v794_v42, %v794_v42 }
 0x197   :  { %v798_v48 = vsub.f32 %v224_v4, %v282_v46  ;;  %315 = vadd.xlane.f32.xlu0 %v301_v47  ;;  %v800_v49 = vsub.f32 %v194_v7, %v276_v45  ;;  %v848_v47 = vld [vmem:[%s904_s4] ss:$0 sm:$0xff]  ;;  %s449_s4 = sshll.u32 %s581_s3, 4  ;;  %s450_s4 = int_to_ptr.vmem [resolvable:$true] %s449_s4 }
 0x198   :  { %v266_v50 = vpop.xlane.xlu1 %265  ;;  %v268_v51 = vpop.xlane.xlu0 %267  ;;  %s555_s10 = scalar_lea.vmem %s450_s4, 1664  ;;  %p560_p1 = scmp.lt.s32.totalorder %s450_s4, %s450_s4 }
 0x199   :  { %v283_v52 = vmul.f32 0.0078125, %v266_v50  ;;  %v284_v53 = vmul.f32 0.0078125, %v268_v51  ;;  %v308_v54 = vmul.f32 %v798_v48, %v798_v48  ;;  %v302_v58 = vmul.f32 %v800_v49, %v800_v49  ;;  %p556_p0 = scmp.ne.s32.totalorder %s450_s4, %s555_s10  ;;  %p561_p2 = scmp.lt.s32.totalorder %s555_s10, %s555_s10 }
 0x19b   :  { %v804_v55 = vsub.f32 %v229_v10, %v283_v52  ;;  %329 = vadd.xlane.f32.xlu1 %v308_v54  ;;  %v808_v59 = vsub.f32 %v234_v13, %v284_v53  ;;  %p562_p3 = por %p561_p2, %p560_p1 }
 0x19c   :  { %v254_v56 = vpop.xlane.xlu1 %253  ;;  %v256_v57 = vpop.xlane.xlu0 %255 }
 0x19d   :  { %v277_v60 = vmul.f32 0.0078125, %v254_v56  ;;  %v278_v61 = vmul.f32 0.0078125, %v256_v57  ;;  %v309_v62 = vmul.f32 %v804_v55, %v804_v55  ;;  %v310_v4 = vmul.f32 %v808_v59, %v808_v59  ;;  %p563_p4 = pnand %p562_p3, %p556_p0 }
 0x19f   :  { %v812_v63 = vsub.f32 %v199_v18, %v277_v60  ;;  %331 = vadd.xlane.f32.xlu0 %v309_v62  ;;  %317 = vadd.xlane.f32.xlu1 %v302_v58  ;;  %v814_v1 = vsub.f32 %v204_v19, %v278_v61 }
 0x1a0   :  { %v258_v0 = vpop.xlane.xlu1 %257 }
 0x1a1   :  { %v279_v2 = vmul.f32 0.0078125, %v258_v0  ;;  %v303_v3 = vmul.f32 %v812_v63, %v812_v63  ;;  %v304_v11 = vmul.f32 %v814_v1, %v814_v1 }
 0x1a3   :  { %v820_v5 = vsub.f32 %v209_v24, %v279_v2  ;;  %319 = vadd.xlane.f32.xlu0 %v303_v3  ;;  %333 = vadd.xlane.f32.xlu1 %v310_v4 }
 0x1a4   :  { %v270_v6 = vpop.xlane.xlu1 %269  ;;  %v260_v7 = vpop.xlane.xlu0 %259 }
 0x1a5   :  { %v285_v8 = vmul.f32 0.0078125, %v270_v6  ;;  %v280_v9 = vmul.f32 0.0078125, %v260_v7  ;;  %v305_v10 = vmul.f32 %v820_v5, %v820_v5 }
 0x1a7   :  { %v826_v12 = vsub.f32 %v239_v27, %v285_v8  ;;  %v828_v13 = vsub.f32 %v214_v29, %v280_v9  ;;  %323 = vadd.xlane.f32.xlu0 %v305_v10  ;;  %321 = vadd.xlane.f32.xlu1 %v304_v11 }
 0x1a8   :  { %v272_v14 = vpop.xlane.xlu0 %271 }
 0x1a9   :  { %v286_v15 = vmul.f32 0.0078125, %v272_v14  ;;  %v311_v16 = vmul.f32 %v826_v12, %v826_v12  ;;  %v306_v17 = vmul.f32 %v828_v13, %v828_v13 }
 0x1ab   :  { %v835_v18 = vsub.f32 %v783_v31, %v286_v15  ;;  %335 = vadd.xlane.f32.xlu0 %v311_v16  ;;  %325 = vadd.xlane.f32.xlu1 %v306_v17 }
 0x1ad   :  { %v312_v19 = vmul.f32 %v835_v18, %v835_v18 }
 0x1af   :  { %337 = vadd.xlane.f32.xlu1 %v312_v19 }
 0x220   :  { %v314_v20 = vpop.xlane.xlu1 %313  ;;  %v328_v21 = vpop.xlane.xlu0 %327 }
 0x221   :  { %v339_v22 = vmul.f32 0.0078125, %v314_v20  ;;  %v346_v23 = vmul.f32 0.0078125, %v328_v21 }
 0x223   :  { %v352_v24 = vadd.f32 1e-05, %v339_v22  ;;  %v359_v25 = vadd.f32 1e-05, %v346_v23 }
 0x224   :  { %v316_v26 = vpop.xlane.xlu0 %315 }
 0x225   :  { %529 = vrsqrt.f32 %v352_v24  ;;  %v340_v27 = vmul.f32 0.0078125, %v316_v26 }
 0x226   :  { %531 = vrsqrt.f32 %v359_v25 }
 0x227   :  { %v353_v28 = vadd.f32 1e-05, %v340_v27 }
 0x228   :  { %v330_v29 = vpop.xlane.xlu1 %329 }
 0x229   :  { %533 = vrsqrt.f32 %v353_v28  ;;  %v347_v30 = vmul.f32 0.0078125, %v330_v29 }
 0x22b   :  { %v360_v31 = vadd.f32 1e-05, %v347_v30 }
 0x22c   :  { %v318_v32 = vpop.xlane.xlu1 %317  ;;  %v332_v33 = vpop.xlane.xlu0 %331 }
 0x22d   :  { %535 = vrsqrt.f32 %v360_v31  ;;  %v341_v34 = vmul.f32 0.0078125, %v318_v32  ;;  %v348_v35 = vmul.f32 0.0078125, %v332_v33 }
 0x22f   :  { %v530_v38 = vpop.eup %529  ;;  %v354_v40 = vadd.f32 1e-05, %v341_v34  ;;  %v361_v41 = vadd.f32 1e-05, %v348_v35 }
 0x230   :  { %v532_v43 = vpop.eup %531  ;;  %v378_v44 = vmul.f32 %v530_v38, %v788_v37  ;;  %v334_v45 = vpop.xlane.xlu1 %333 }
 0x231   :  { %v320_v46 = vpop.xlane.xlu0 %319  ;;  %v385_v50 = vmul.f32 %v532_v43, %v786_v36  ;;  %537 = vrsqrt.f32 %v354_v40  ;;  %v349_v51 = vmul.f32 0.0078125, %v334_v45 }
 0x232   :  { %v342_v52 = vmul.f32 0.0078125, %v320_v46  ;;  %v398_v53 = vmul.f32 %v842_v39, %v378_v44  ;;  %539 = vrsqrt.f32 %v361_v41 }
 0x233   :  { %v534_v54 = vpop.eup %533  ;;  %v405_v56 = vmul.f32 %v842_v39, %v385_v50  ;;  %v362_v57 = vadd.f32 1e-05, %v349_v51 }
 0x234   :  { %v355_v37 = vadd.f32 1e-05, %v342_v52  ;;  %v418_v58 = vadd.f32 %v848_v47, %v398_v53  ;;  %v379_v60 = vmul.f32 %v534_v54, %v794_v42  ;;  %v322_v61 = vpop.xlane.xlu1 %321 }
 0x235   :  { %v324_v62 = vpop.xlane.xlu0 %323  ;;  %v425_v0 = vadd.f32 %v848_v47, %v405_v56  ;;  %541 = vrsqrt.f32 %v362_v57  ;;  %v343_v36 = vmul.f32 0.0078125, %v322_v61 }
 0x236   :  { %v344_v2 = vmul.f32 0.0078125, %v324_v62  ;;  %431 = vst [vmem:[#allocation2] sm:$0xff] %v418_v58  ;;  %v399_v3 = vmul.f32 %v842_v39, %v379_v60  ;;  %543 = vrsqrt.f32 %v355_v37 }
 0x237   :  { %v536_v4 = vpop.eup %535  ;;  %438 = vst [vmem:[#allocation2 + $0x38] sm:$0xff] %v425_v0  ;;  %v356_v6 = vadd.f32 1e-05, %v343_v36 }
 0x238   :  { %v357_v7 = vadd.f32 1e-05, %v344_v2  ;;  %v419_v8 = vadd.f32 %v848_v47, %v399_v3  ;;  %v386_v9 = vmul.f32 %v536_v4, %v798_v48  ;;  %v326_v42 = vpop.xlane.xlu1 %325 }
 0x239   :  { %v336_v10 = vpop.xlane.xlu0 %335  ;;  %545 = vrsqrt.f32 %v356_v6  ;;  %v345_v11 = vmul.f32 0.0078125, %v326_v42 }
 0x23a   :  { %v350_v14 = vmul.f32 0.0078125, %v336_v10  ;;  %432 = vst [vmem:[#allocation2 + $0x8] sm:$0xff] %v419_v8  ;;  %v406_v15 = vmul.f32 %v842_v39, %v386_v9  ;;  %547 = vrsqrt.f32 %v357_v7 }
 0x23b   :  { %v538_v16 = vpop.eup %537  ;;  %v358_v17 = vadd.f32 1e-05, %v345_v11 }
 0x23c   :  { %v363_v19 = vadd.f32 1e-05, %v350_v14  ;;  %v540_v20 = vpop.eup %539  ;;  %v426_v21 = vadd.f32 %v848_v47, %v406_v15  ;;  %v380_v22 = vmul.f32 %v538_v16, %v800_v49  ;;  %v338_v23 = vpop.xlane.xlu1 %337 }
 0x23d   :  { %v387_v48 = vmul.f32 %v540_v20, %v804_v55  ;;  %549 = vrsqrt.f32 %v358_v17  ;;  %v351_v24 = vmul.f32 0.0078125, %v338_v23 }
 0x23e   :  { %439 = vst [vmem:[#allocation2 + $0x40] sm:$0xff] %v426_v21  ;;  %v400_v25 = vmul.f32 %v842_v39, %v380_v22  ;;  %551 = vrsqrt.f32 %v363_v19 }
 0x23f   :  { %v542_v26 = vpop.eup %541  ;;  %v407_v27 = vmul.f32 %v842_v39, %v387_v48  ;;  %v364_v28 = vadd.f32 1e-05, %v351_v24 }
 0x240   :  { %v544_v29 = vpop.eup %543  ;;  %v420_v30 = vadd.f32 %v848_v47, %v400_v25  ;;  %v388_v31 = vmul.f32 %v542_v26, %v808_v59 }
 0x241   :  { %v427_v49 = vadd.f32 %v848_v47, %v407_v27  ;;  %v381_v32 = vmul.f32 %v544_v29, %v812_v63  ;;  %553 = vrsqrt.f32 %v364_v28 }
 0x242   :  { %433 = vst [vmem:[#allocation2 + $0x10] sm:$0xff] %v420_v30  ;;  %v408_v55 = vmul.f32 %v842_v39, %v388_v31 }
 0x243   :  { %v546_v33 = vpop.eup %545  ;;  %440 = vst [vmem:[#allocation2 + $0x48] sm:$0xff] %v427_v49  ;;  %v401_v34 = vmul.f32 %v842_v39, %v381_v32 }
 0x244   :  { %v548_v35 = vpop.eup %547  ;;  %v428_v38 = vadd.f32 %v848_v47, %v408_v55  ;;  %v382_v40 = vmul.f32 %v546_v33, %v814_v1 }
 0x245   :  { %v421_v41 = vadd.f32 %v848_v47, %v401_v34  ;;  %v383_v59 = vmul.f32 %v548_v35, %v820_v5 }
 0x246   :  { %441 = vst [vmem:[#allocation2 + $0x50] sm:$0xff] %v428_v38  ;;  %v402_v63 = vmul.f32 %v842_v39, %v382_v40 }
 0x247   :  { %v550_v43 = vpop.eup %549  ;;  %434 = vst [vmem:[#allocation2 + $0x18] sm:$0xff] %v421_v41  ;;  %v403_v44 = vmul.f32 %v842_v39, %v383_v59 }
 0x248   :  { %v552_v45 = vpop.eup %551  ;;  %v422_v46 = vadd.f32 %v848_v47, %v402_v63  ;;  %v384_v50 = vmul.f32 %v550_v43, %v828_v13 }
 0x249   :  { %v423_v51 = vadd.f32 %v848_v47, %v403_v44  ;;  %v389_v1 = vmul.f32 %v552_v45, %v826_v12 }
 0x24a   :  { %435 = vst [vmem:[#allocation2 + $0x20] sm:$0xff] %v422_v46  ;;  %v404_v52 = vmul.f32 %v842_v39, %v384_v50 }
 0x24b   :  { %v554_v5 = vpop.eup %553  ;;  %436 = vst [vmem:[#allocation2 + $0x28] sm:$0xff] %v423_v51  ;;  %v409_v53 = vmul.f32 %v842_v39, %v389_v1 }
 0x24c   :  { %v424_v54 = vadd.f32 %v848_v47, %v404_v52  ;;  %v390_v56 = vmul.f32 %v554_v5, %v835_v18 }
 0x24d   :  { %v429_v57 = vadd.f32 %v848_v47, %v409_v53 }
 0x24e   :  { %437 = vst [vmem:[#allocation2 + $0x30] sm:$0xff] %v424_v54  ;;  %v410_v13 = vmul.f32 %v842_v39, %v390_v56 }
 0x24f   :  { %442 = vst [vmem:[#allocation2 + $0x58] sm:$0xff] %v429_v57 }
 0x250   :  { %v430_v12 = vadd.f32 %v848_v47, %v410_v13 }
 0x252   :  { %443 = vst [vmem:[#allocation2 + $0x60] sm:$0xff] %v430_v12 }
 0x253   :  { %566 = shalt.err (!%p563_p4)
}
 0x254   :  { %s567_s13 = scalar_lea.hbm %s905_s5, 1664 }
 0x255   :  { %p568_p5 = scmp.ne.s32.totalorder %s905_s5, %s567_s13  ;;  %p571_p6 = scmp.lt.u32.totalorder %s567_s13, %s905_s5 }
 0x257   :  { %p573_p7 = pnand %p571_p6, %p568_p5 }
 0x259   :  { %576 = shalt.err (!%p573_p7)
}
 0x25a   :  { %s582_s1 = smov 128   ;;  %s583_s18 = smov 8  }
 0x25b   :  { %455 = dma.vmem_to_hbm [thread:$0]  %s450_s4, 1664, %s905_s5, [#allocation3], %s582_s1, %s582_s1, %s583_s18  }
 0x25c   :  { %577 = dma.done.wait [#allocation3], 1664  }
 0x25d   :  { %578 = vsyncadd [#allocation3], 4294965632 }
 0x25e   :  { %459 = vsyncpa [#allocation3], 1 }

</bundles_post_ra>
